<compile_context>
chip_gen: v7x
topology: tpu7x:2x2x1
jax: 0.10.0
libtpu: 0.0.40
codegen_flags: <defaults>
</compile_context>

<pallas_src>
import functools

import jax
import jax.numpy as jnp
from jax.experimental import pallas as pl
from jax.experimental.pallas import tpu as pltpu

TEMP_T = 0.04  # teacher temperature (self.temp_t)
TEMP_S = 0.1   # student temperature (self.temp_s)

_DEFAULT_TILE_CAP = 1024      # rows per batch tile (cap)
_VMEM_BUDGET_BYTES = 24 << 20  # budget for pipelined inputs + per-pair intermediates
_VMEM_LIMIT_BYTES = 32 << 20   # scoped VMEM request (<= physical on v5e/v6e/v7x)
_MAX_CORES = 2                 # v7x has 2 TensorCores; harmless on v5e/v6e


def _round_up(x, m):
    return ((x + m - 1) // m) * m


def _cdiv(a, b):
    return (a + b - 1) // b


def _batch_tiling(b, c, n_wide_streams, n_label_streams=0,
                  tile_cap=_DEFAULT_TILE_CAP):
    """tile_b (multiple of 8) sized so 2 pipeline buffers per input stream plus
    ~6 tile-sized f32 intermediates for the pair being processed fit the budget."""
    per_row = (2 * n_wide_streams + 6) * c * 4 + n_label_streams * 2 * 128 * 4
    budget_rows = (_VMEM_BUDGET_BYTES // max(per_row, 1)) // 8 * 8
    tile_b = max(8, min(tile_cap, budget_rows, _round_up(b, 8)))
    num_tiles = _cdiv(b, tile_b)
    return tile_b, num_tiles


def _core_split(num_tiles, max_cores=_MAX_CORES):
    nc = max(1, min(max_cores, num_tiles))
    return nc, _cdiv(num_tiles, nc)


def _make_row_map(tiles_per_core, num_tiles):
    last = num_tiles - 1

    def row_map(cc, t):
        # clamp so out-of-range (core, tile) pairs re-read a valid block; the
        # in-kernel row mask zeroes their contribution.
        return (jnp.minimum(cc * tiles_per_core + t, last), 0)

    return row_map


# --------------------------------------------------------------------------
# Kernel 1: fused soft-target cross entropy over P unstacked (q, k) pairs
#   loss_p = mean_b sum_c [ -softmax(k/temp_t) * log_softmax(q/temp_s) ]
# --------------------------------------------------------------------------
def _soft_ce_kernel(*refs, npairs, tile_b, tiles_per_core, total_b, inv_b,
                    inv_temp_s, inv_temp_t):
    out_ref = refs[-1]                                    # (npairs, 8, 128)
    cc = pl.program_id(0)
    t = pl.program_id(1)

    @pl.when(t == 0)
    def _init():
        out_ref[...] = jnp.zeros_like(out_ref)

    row0 = (cc * tiles_per_core + t) * tile_b
    row_ids = row0 + jax.lax.broadcasted_iota(jnp.int32, (tile_b, 1), 0)
    row_mask = row_ids < total_b                          # masks ragged/dup tiles

    for i in range(npairs):                               # static unroll over pairs
        q = refs[2 * i][...].astype(jnp.float32) * inv_temp_s      # (tile_b, C)
        k = refs[2 * i + 1][...].astype(jnp.float32) * inv_temp_t  # (tile_b, C)

        # teacher: only exp(k - max) and its row-sum are needed
        k_max = jnp.max(k, axis=1, keepdims=True)
        k_exp = jnp.exp(k - k_max)
        k_sum = jnp.sum(k_exp, axis=1, keepdims=True)     # (tile_b, 1)

        # student: shifted logits + log-sum-exp
        q_sh = q - jnp.max(q, axis=1, keepdims=True)
        q_lse = jnp.log(jnp.sum(jnp.exp(q_sh), axis=1, keepdims=True))

        # sum_c -softmax(k) * log_softmax(q) == q_lse - sum_c(k_exp*q_sh)/k_sum
        dot_kq = jnp.sum(k_exp * q_sh, axis=1, keepdims=True)
        per_row = q_lse - dot_kq * pl.reciprocal(k_sum)
        per_row = jnp.where(row_mask, per_row, 0.0)       # select before reduce

        tile_sum = jnp.sum(per_row, axis=0, keepdims=True) * inv_b  # (1, 1)
        out_ref[i] = out_ref[i] + tile_sum                # broadcast to (8, 128)


def fused_soft_ce(qs, ks, temp_s=TEMP_S, temp_t=TEMP_T,
                  tile_cap=_DEFAULT_TILE_CAP):
    """qs, ks: lists of P arrays of shape (B, C) -> (P,) per-pair soft-CE losses."""
    p = len(qs)
    b, c = qs[0].shape
    tile_b, num_tiles = _batch_tiling(b, c, n_wide_streams=2 * p,
                                      tile_cap=tile_cap)
    nc, tiles_per_core = _core_split(num_tiles)
    row_map = _make_row_map(tiles_per_core, num_tiles)
    wide_spec = pl.BlockSpec((tile_b, c), row_map)

    flat_inputs, in_specs = [], []
    for q, k in zip(qs, ks):
        flat_inputs += [q, k]
        in_specs += [wide_spec, wide_spec]

    kernel = functools.partial(
        _soft_ce_kernel, npairs=p, tile_b=tile_b, tiles_per_core=tiles_per_core,
        total_b=b, inv_b=1.0 / b, inv_temp_s=1.0 / temp_s, inv_temp_t=1.0 / temp_t)

    out = pl.pallas_call(
        kernel,
        out_shape=jax.ShapeDtypeStruct((nc, p, 8, 128), jnp.float32),
        grid_spec=pltpu.PrefetchScalarGridSpec(
            num_scalar_prefetch=0,
            grid=(nc, tiles_per_core),
            in_specs=in_specs,
            out_specs=pl.BlockSpec((None, p, 8, 128), lambda cc, t: (cc, 0, 0, 0)),
        ),
        compiler_params=pltpu.CompilerParams(
            dimension_semantics=("parallel", "arbitrary"),
            vmem_limit_bytes=_VMEM_LIMIT_BYTES),
    )(*flat_inputs)
    return jnp.sum(out[:, :, 0, 0], axis=0)               # (P,)


# --------------------------------------------------------------------------
# Kernel 2: fused hard-label cross entropy over P unstacked (logits, labels) pairs
#   loss_p = mean_b [ -log_softmax(logits)[b, labels[b]] ]
# --------------------------------------------------------------------------
def _hard_ce_kernel(*refs, npairs, tile_b, tiles_per_core, total_b, inv_b):
    out_ref = refs[-1]                                    # (npairs, 8, 128)
    cc = pl.program_id(0)
    t = pl.program_id(1)

    @pl.when(t == 0)
    def _init():
        out_ref[...] = jnp.zeros_like(out_ref)

    row0 = (cc * tiles_per_core + t) * tile_b
    row_ids = row0 + jax.lax.broadcasted_iota(jnp.int32, (tile_b, 1), 0)
    row_mask = row_ids < total_b

    for i in range(npairs):
        x = refs[2 * i][...].astype(jnp.float32)          # (tile_b, C)
        lab = refs[2 * i + 1][...]                        # (tile_b, 1) int32

        x_max = jnp.max(x, axis=1, keepdims=True)
        sh = x - x_max
        lse = jnp.log(jnp.sum(jnp.exp(sh), axis=1, keepdims=True))

        class_ids = jax.lax.broadcasted_iota(jnp.int32, x.shape, 1)
        picked = jnp.sum(jnp.where(class_ids == lab, sh, 0.0),
                         axis=1, keepdims=True)
        per_row = jnp.where(row_mask, lse - picked, 0.0)

        tile_sum = jnp.sum(per_row, axis=0, keepdims=True) * inv_b
        out_ref[i] = out_ref[i] + tile_sum


def fused_hard_ce(xs, labels_list, tile_cap=_DEFAULT_TILE_CAP):
    """xs: list of P (B, C) logits, labels_list: list of P (B,) ints -> (P,) losses."""
    p = len(xs)
    b, c = xs[0].shape
    tile_b, num_tiles = _batch_tiling(b, c, n_wide_streams=p, n_label_streams=p,
                                      tile_cap=tile_cap)
    nc, tiles_per_core = _core_split(num_tiles)
    row_map = _make_row_map(tiles_per_core, num_tiles)
    wide_spec = pl.BlockSpec((tile_b, c), row_map)
    lab_spec = pl.BlockSpec((tile_b, 1), row_map)

    flat_inputs, in_specs = [], []
    for x, y in zip(xs, labels_list):
        flat_inputs += [x, y.astype(jnp.int32).reshape(b, 1)]
        in_specs += [wide_spec, lab_spec]

    kernel = functools.partial(
        _hard_ce_kernel, npairs=p, tile_b=tile_b, tiles_per_core=tiles_per_core,
        total_b=b, inv_b=1.0 / b)

    out = pl.pallas_call(
        kernel,
        out_shape=jax.ShapeDtypeStruct((nc, p, 8, 128), jnp.float32),
        grid_spec=pltpu.PrefetchScalarGridSpec(
            num_scalar_prefetch=0,
            grid=(nc, tiles_per_core),
            in_specs=in_specs,
            out_specs=pl.BlockSpec((None, p, 8, 128), lambda cc, t: (cc, 0, 0, 0)),
        ),
        compiler_params=pltpu.CompilerParams(
            dimension_semantics=("parallel", "arbitrary"),
            vmem_limit_bytes=_VMEM_LIMIT_BYTES),
    )(*flat_inputs)
    return jnp.sum(out[:, :, 0, 0], axis=0)               # (P,)


# --------------------------------------------------------------------------
# CGHLoss.forward equivalent (glue in plain JAX, losses in 2 fused Pallas calls)
# --------------------------------------------------------------------------
def cgh_loss_forward(logits_q, logits_k, logits_q_hyper, logits_k_hyper,
                     logits, labels, logits_hyper, labels_hyper,
                     local_logits_q, local_logits_k,
                     temp_t=TEMP_T, temp_s=TEMP_S, tile_cap=_DEFAULT_TILE_CAP):
    loss_pack = {}

    # ---- hard-label CE terms (nn.CrossEntropyLoss), fused into one launch ----
    if logits is not None:
        hard_losses = fused_hard_ce([logits, logits_hyper],
                                    [labels, labels_hyper], tile_cap=tile_cap)
        loss_pack["cl"] = hard_losses[0] + hard_losses[1]
    else:
        loss_pack["cl"] = jnp.float32(0.0)

    # ---- soft-target CE terms, all pairs fused into one launch ----
    # (teacher .detach() is autograd-only; no forward effect)
    soft_q = [logits_q_hyper, logits_q]
    soft_k = [logits_k, logits_k_hyper]
    num_local = 0
    if local_logits_q is not None:
        num_local = len(local_logits_q)
        soft_q += list(local_logits_q)
        soft_k += list(local_logits_k)

    soft_losses = fused_soft_ce(soft_q, soft_k, temp_s, temp_t, tile_cap=tile_cap)

    loss_pack["cl_hyper"] = soft_losses[0]
    csist = soft_losses[1]
    if local_logits_q is not None:
        csist = (csist + jnp.sum(soft_losses[2:])) / (num_local + 1)
    loss_pack["csist"] = csist
    return loss_pack


if __name__ == "__main__":
    key = jax.random.PRNGKey(0)
    B, C = 20, 128          # B not tile-aligned -> exercises ragged-tile masking
    NUM_LOCAL = 2
    TILE_CAP = 8            # small tile -> >1 batch tile + both core slots exercised

    keys = jax.random.split(key, 8 + 2 * NUM_LOCAL)
    logits_q = jax.random.normal(keys[0], (B, C), jnp.float32)
    logits_k = jax.random.normal(keys[1], (B, C), jnp.float32)
    logits_q_hyper = jax.random.normal(keys[2], (B, C), jnp.float32)
    logits_k_hyper = jax.random.normal(keys[3], (B, C), jnp.float32)
    logits = jax.random.normal(keys[4], (B, C), jnp.float32)
    labels = jax.random.randint(keys[5], (B,), 0, C, jnp.int32)
    logits_hyper = jax.random.normal(keys[6], (B, C), jnp.float32)
    labels_hyper = jax.random.randint(keys[7], (B,), 0, C, jnp.int32)
    local_logits_q = [
        jax.random.normal(keys[8 + i], (B, C), jnp.float32) for i in range(NUM_LOCAL)
    ]
    local_logits_k = [
        jax.random.normal(keys[8 + NUM_LOCAL + i], (B, C), jnp.float32)
        for i in range(NUM_LOCAL)
    ]

    loss_pack = cgh_loss_forward(
        logits_q, logits_k, logits_q_hyper, logits_k_hyper,
        logits, labels, logits_hyper, labels_hyper,
        local_logits_q, local_logits_k,
        tile_cap=TILE_CAP,
    )
    jax.block_until_ready(loss_pack)

    # ---- plain-JAX reference ----
    def ref_soft_ce(q, k):
        t = jax.nn.softmax(k / TEMP_T, axis=1)
        lp = jax.nn.log_softmax(q / TEMP_S, axis=1)
        return jnp.mean(jnp.sum(-t * lp, axis=1))

    def ref_hard_ce(x, y):
        lp = jax.nn.log_softmax(x, axis=1)
        return jnp.mean(-jnp.take_along_axis(lp, y[:, None], axis=1))

    ref_cl = ref_hard_ce(logits, labels) + ref_hard_ce(logits_hyper, labels_hyper)
    ref_cl_hyper = ref_soft_ce(logits_q_hyper, logits_k)
    ref_csist = ref_soft_ce(logits_q, logits_k_hyper)
    for lq, lk in zip(local_logits_q, local_logits_k):
        ref_csist = ref_csist + ref_soft_ce(lq, lk)
    ref_csist = ref_csist / (NUM_LOCAL + 1)

    assert jnp.allclose(loss_pack["cl"], ref_cl, rtol=1e-4, atol=1e-4)
    assert jnp.allclose(loss_pack["cl_hyper"], ref_cl_hyper, rtol=1e-4, atol=1e-4)
    assert jnp.allclose(loss_pack["csist"], ref_csist, rtol=1e-4, atol=1e-4)

    print("KERNEL_OK")
</pallas_src>

<mosaic_0001>
module attributes {stable_mosaic.version = 11 : i64} {
  func.func @_hard_ce_kernel(%arg0: i32, %arg1: i32, %arg2: memref<8x128xf32, #tpu.memory_space<vmem>>, %arg3: memref<8x1xi32, #tpu.memory_space<vmem>>, %arg4: memref<8x128xf32, #tpu.memory_space<vmem>>, %arg5: memref<8x1xi32, #tpu.memory_space<vmem>>, %arg6: memref<1x2x8x128xf32, #tpu.memory_space<vmem>>) attributes {dimension_semantics = [#tpu.dimension_semantics<parallel>, #tpu.dimension_semantics<arbitrary>], iteration_bounds = array<i64: 2, 2>, scalar_prefetch = 0 : i64, scratch_operands = 0 : i64, tpu.core_type = #tpu.core_type<tc>, window_params = [{transform_indices = @transform_0, window_bounds = array<i64: 8, 128>}, {transform_indices = @transform_1, window_bounds = array<i64: 8, 1>}, {transform_indices = @transform_2, window_bounds = array<i64: 8, 128>}, {transform_indices = @transform_3, window_bounds = array<i64: 8, 1>}, {transform_indices = @transform_4, window_bounds = array<i64: 1, 2, 8, 128>}]} {
    %c0_i32 = arith.constant 0 : i32
    %0 = arith.cmpi eq, %arg1, %c0_i32 : i32
    %1 = arith.extui %0 : i1 to i32
    %c0_i32_0 = arith.constant 0 : i32
    %2 = arith.cmpi ne, %1, %c0_i32_0 : i32
    scf.if %2 {
      %cst_36 = arith.constant 0.000000e+00 : f32
      %73 = vector.broadcast %cst_36 : f32 to vector<2x8x128xf32>
      %c0_37 = arith.constant 0 : index
      %c0_38 = arith.constant 0 : index
      %c0_39 = arith.constant 0 : index
      %c0_40 = arith.constant 0 : index
      %74 = vector.load %arg6[%c0_37, %c0_38, %c0_39, %c0_40] : memref<1x2x8x128xf32, #tpu.memory_space<vmem>>, vector<1x2x8x128xf32>
      %75 = vector.shape_cast %74 : vector<1x2x8x128xf32> to vector<2x8x128xf32>
      %76 = vector.shape_cast %73 : vector<2x8x128xf32> to vector<1x2x8x128xf32>
      tpu.vector_store %arg6[%c0_37, %c0_38, %c0_39, %c0_40], %76 {strides = array<i32>} : memref<1x2x8x128xf32, #tpu.memory_space<vmem>>, vector<1x2x8x128xf32>,
    } else {
    }
    %c2_i32 = arith.constant 2 : i32
    %3 = arith.muli %arg0, %c2_i32 : i32
    %4 = arith.addi %3, %arg1 : i32
    %c8_i32 = arith.constant 8 : i32
    %5 = arith.muli %4, %c8_i32 : i32
    %6 = tpu.iota {dimensions = array<i32: 0>} : vector<8x1xi32>
    %7 = vector.broadcast %5 : i32 to vector<8x1xi32>
    %8 = arith.addi %7, %6 : vector<8x1xi32>
    %c20_i32 = arith.constant 20 : i32
    %9 = vector.broadcast %c20_i32 : i32 to vector<8x1xi32>
    %10 = arith.cmpi slt, %8, %9 : vector<8x1xi32>
    %c0 = arith.constant 0 : index
    %c0_1 = arith.constant 0 : index
    %11 = vector.load %arg2[%c0, %c0_1] : memref<8x128xf32, #tpu.memory_space<vmem>>, vector<8x128xf32>
    %c0_2 = arith.constant 0 : index
    %c0_3 = arith.constant 0 : index
    %12 = vector.load %arg3[%c0_2, %c0_3] : memref<8x1xi32, #tpu.memory_space<vmem>>, vector<8x1xi32>
    %cst = arith.constant dense<0xFF800000> : vector<8xf32>
    %13 = vector.multi_reduction <maximumf>, %11, %cst [1] : vector<8x128xf32> to vector<8xf32>
    %14 = vector.shape_cast %13 : vector<8xf32> to vector<8x1xf32>
    %15 = vector.broadcast %14 : vector<8x1xf32> to vector<8x128xf32>
    %16 = arith.subf %11, %15 : vector<8x128xf32>
    %17 = math.exp %16 : vector<8x128xf32>
    %cst_4 = arith.constant dense<0.000000e+00> : vector<8xf32>
    %18 = vector.multi_reduction <add>, %17, %cst_4 [1] : vector<8x128xf32> to vector<8xf32>
    %19 = vector.shape_cast %18 : vector<8xf32> to vector<8x1xf32>
    %20 = math.log %19 : vector<8x1xf32>
    %21 = tpu.iota {dimensions = array<i32: 1>} : vector<8x128xi32>
    %22 = vector.broadcast %12 : vector<8x1xi32> to vector<8x128xi32>
    %23 = arith.cmpi eq, %21, %22 : vector<8x128xi32>
    %cst_5 = arith.constant 0.000000e+00 : f32
    %24 = vector.broadcast %cst_5 : f32 to vector<8x128xf32>
    %25 = arith.select %23, %16, %24 : vector<8x128xi1>, vector<8x128xf32>
    %cst_6 = arith.constant dense<0.000000e+00> : vector<8xf32>
    %26 = vector.multi_reduction <add>, %25, %cst_6 [1] : vector<8x128xf32> to vector<8xf32>
    %27 = vector.shape_cast %26 : vector<8xf32> to vector<8x1xf32>
    %28 = arith.subf %20, %27 : vector<8x1xf32>
    %cst_7 = arith.constant 0.000000e+00 : f32
    %29 = vector.broadcast %cst_7 : f32 to vector<8x1xf32>
    %30 = arith.select %10, %28, %29 : vector<8x1xi1>, vector<8x1xf32>
    %cst_8 = arith.constant dense<0.000000e+00> : vector<1xf32>
    %31 = vector.multi_reduction <add>, %30, %cst_8 [0] : vector<8x1xf32> to vector<1xf32>
    %32 = vector.shape_cast %31 : vector<1xf32> to vector<1x1xf32>
    %cst_9 = arith.constant 5.000000e-02 : f32
    %33 = vector.broadcast %cst_9 : f32 to vector<1x1xf32>
    %34 = arith.mulf %32, %33 : vector<1x1xf32>
    %c0_10 = arith.constant 0 : index
    %c0_11 = arith.constant 0 : index
    %c0_12 = arith.constant 0 : index
    %c0_13 = arith.constant 0 : index
    %35 = vector.load %arg6[%c0_10, %c0_11, %c0_12, %c0_13] : memref<1x2x8x128xf32, #tpu.memory_space<vmem>>, vector<1x1x8x128xf32>
    %36 = vector.shape_cast %35 : vector<1x1x8x128xf32> to vector<8x128xf32>
    %37 = vector.broadcast %34 : vector<1x1xf32> to vector<8x128xf32>
    %38 = arith.addf %36, %37 : vector<8x128xf32>
    %c0_14 = arith.constant 0 : index
    %c0_15 = arith.constant 0 : index
    %c0_16 = arith.constant 0 : index
    %c0_17 = arith.constant 0 : index
    %39 = vector.load %arg6[%c0_14, %c0_15, %c0_16, %c0_17] : memref<1x2x8x128xf32, #tpu.memory_space<vmem>>, vector<1x1x8x128xf32>
    %40 = vector.shape_cast %39 : vector<1x1x8x128xf32> to vector<8x128xf32>
    %41 = vector.shape_cast %38 : vector<8x128xf32> to vector<1x1x8x128xf32>
    tpu.vector_store %arg6[%c0_14, %c0_15, %c0_16, %c0_17], %41 {strides = array<i32>} : memref<1x2x8x128xf32, #tpu.memory_space<vmem>>, vector<1x1x8x128xf32>,
    %c0_18 = arith.constant 0 : index
    %c0_19 = arith.constant 0 : index
    %42 = vector.load %arg4[%c0_18, %c0_19] : memref<8x128xf32, #tpu.memory_space<vmem>>, vector<8x128xf32>
    %c0_20 = arith.constant 0 : index
    %c0_21 = arith.constant 0 : index
    %43 = vector.load %arg5[%c0_20, %c0_21] : memref<8x1xi32, #tpu.memory_space<vmem>>, vector<8x1xi32>
    %cst_22 = arith.constant dense<0xFF800000> : vector<8xf32>
    %44 = vector.multi_reduction <maximumf>, %42, %cst_22 [1] : vector<8x128xf32> to vector<8xf32>
    %45 = vector.shape_cast %44 : vector<8xf32> to vector<8x1xf32>
    %46 = vector.broadcast %45 : vector<8x1xf32> to vector<8x128xf32>
    %47 = arith.subf %42, %46 : vector<8x128xf32>
    %48 = math.exp %47 : vector<8x128xf32>
    %cst_23 = arith.constant dense<0.000000e+00> : vector<8xf32>
    %49 = vector.multi_reduction <add>, %48, %cst_23 [1] : vector<8x128xf32> to vector<8xf32>
    %50 = vector.shape_cast %49 : vector<8xf32> to vector<8x1xf32>
    %51 = math.log %50 : vector<8x1xf32>
    %52 = tpu.iota {dimensions = array<i32: 1>} : vector<8x128xi32>
    %53 = vector.broadcast %43 : vector<8x1xi32> to vector<8x128xi32>
    %54 = arith.cmpi eq, %52, %53 : vector<8x128xi32>
    %cst_24 = arith.constant 0.000000e+00 : f32
    %55 = vector.broadcast %cst_24 : f32 to vector<8x128xf32>
    %56 = arith.select %54, %47, %55 : vector<8x128xi1>, vector<8x128xf32>
    %cst_25 = arith.constant dense<0.000000e+00> : vector<8xf32>
    %57 = vector.multi_reduction <add>, %56, %cst_25 [1] : vector<8x128xf32> to vector<8xf32>
    %58 = vector.shape_cast %57 : vector<8xf32> to vector<8x1xf32>
    %59 = arith.subf %51, %58 : vector<8x1xf32>
    %cst_26 = arith.constant 0.000000e+00 : f32
    %60 = vector.broadcast %cst_26 : f32 to vector<8x1xf32>
    %61 = arith.select %10, %59, %60 : vector<8x1xi1>, vector<8x1xf32>
    %cst_27 = arith.constant dense<0.000000e+00> : vector<1xf32>
    %62 = vector.multi_reduction <add>, %61, %cst_27 [0] : vector<8x1xf32> to vector<1xf32>
    %63 = vector.shape_cast %62 : vector<1xf32> to vector<1x1xf32>
    %cst_28 = arith.constant 5.000000e-02 : f32
    %64 = vector.broadcast %cst_28 : f32 to vector<1x1xf32>
    %65 = arith.mulf %63, %64 : vector<1x1xf32>
    %c0_29 = arith.constant 0 : index
    %c1 = arith.constant 1 : index
    %c0_30 = arith.constant 0 : index
    %c0_31 = arith.constant 0 : index
    %66 = vector.load %arg6[%c0_29, %c1, %c0_30, %c0_31] : memref<1x2x8x128xf32, #tpu.memory_space<vmem>>, vector<1x1x8x128xf32>
    %67 = vector.shape_cast %66 : vector<1x1x8x128xf32> to vector<8x128xf32>
    %68 = vector.broadcast %65 : vector<1x1xf32> to vector<8x128xf32>
    %69 = arith.addf %67, %68 : vector<8x128xf32>
    %c0_32 = arith.constant 0 : index
    %c1_33 = arith.constant 1 : index
    %c0_34 = arith.constant 0 : index
    %c0_35 = arith.constant 0 : index
    %70 = vector.load %arg6[%c0_32, %c1_33, %c0_34, %c0_35] : memref<1x2x8x128xf32, #tpu.memory_space<vmem>>, vector<1x1x8x128xf32>
    %71 = vector.shape_cast %70 : vector<1x1x8x128xf32> to vector<8x128xf32>
    %72 = vector.shape_cast %69 : vector<8x128xf32> to vector<1x1x8x128xf32>
    tpu.vector_store %arg6[%c0_32, %c1_33, %c0_34, %c0_35], %72 {strides = array<i32>} : memref<1x2x8x128xf32, #tpu.memory_space<vmem>>, vector<1x1x8x128xf32>,
    return
  }
  func.func @transform_0(%arg0: i32, %arg1: i32) -> (i32, i32) {
    %c2_i32 = arith.constant 2 : i32
    %0 = arith.muli %arg0, %c2_i32 : i32
    %1 = arith.addi %0, %arg1 : i32
    %c2_i32_0 = arith.constant 2 : i32
    %2 = arith.minsi %1, %c2_i32_0 : i32
    %c0_i32 = arith.constant 0 : i32
    %c0_i32_1 = arith.constant 0 : i32
    return %2, %c0_i32 : i32, i32
  }
  func.func @transform_1(%arg0: i32, %arg1: i32) -> (i32, i32) {
    %c2_i32 = arith.constant 2 : i32
    %0 = arith.muli %arg0, %c2_i32 : i32
    %1 = arith.addi %0, %arg1 : i32
    %c2_i32_0 = arith.constant 2 : i32
    %2 = arith.minsi %1, %c2_i32_0 : i32
    %c0_i32 = arith.constant 0 : i32
    %c0_i32_1 = arith.constant 0 : i32
    return %2, %c0_i32 : i32, i32
  }
  func.func @transform_2(%arg0: i32, %arg1: i32) -> (i32, i32) {
    %c2_i32 = arith.constant 2 : i32
    %0 = arith.muli %arg0, %c2_i32 : i32
    %1 = arith.addi %0, %arg1 : i32
    %c2_i32_0 = arith.constant 2 : i32
    %2 = arith.minsi %1, %c2_i32_0 : i32
    %c0_i32 = arith.constant 0 : i32
    %c0_i32_1 = arith.constant 0 : i32
    return %2, %c0_i32 : i32, i32
  }
  func.func @transform_3(%arg0: i32, %arg1: i32) -> (i32, i32) {
    %c2_i32 = arith.constant 2 : i32
    %0 = arith.muli %arg0, %c2_i32 : i32
    %1 = arith.addi %0, %arg1 : i32
    %c2_i32_0 = arith.constant 2 : i32
    %2 = arith.minsi %1, %c2_i32_0 : i32
    %c0_i32 = arith.constant 0 : i32
    %c0_i32_1 = arith.constant 0 : i32
    return %2, %c0_i32 : i32, i32
  }
  func.func @transform_4(%arg0: i32, %arg1: i32) -> (i32, i32, i32, i32) {
    %c0_i32 = arith.constant 0 : i32
    %c0_i32_0 = arith.constant 0 : i32
    %c0_i32_1 = arith.constant 0 : i32
    %c0_i32_2 = arith.constant 0 : i32
    return %arg0, %c0_i32, %c0_i32_0, %c0_i32_1 : i32, i32, i32, i32
  }
}

</mosaic_0001>

<bundles_post_ra>
// kernel: tpu_custom_call.1
= control target key start
LH: loop header
LB: loop body
LE: loop exit
PB: predicated region body
PF: predicated region fallthrough
CT: control target
= control target key end

     0   :  { %9 = vsyncpa [#allocation3], 0  ;;  %s987_s0 = inlined_call_operand.vmem [shape: f32[20,128], index: 0, kind: input, shape index: {}]   ;;  %s988_s1 = inlined_call_operand.vmem [shape: s32[20,1], index: 1, kind: input, shape index: {}]   ;;  %s989_s2 = inlined_call_operand.vmem [shape: f32[20,128], index: 2, kind: input, shape index: {}]   ;;  %s990_s3 = inlined_call_operand.vmem [shape: s32[20,1], index: 3, kind: input, shape index: {}]   ;;  %s991_s4 = inlined_call_operand.hbm [shape: f32[2,2,8,128], index: 4, kind: output, shape index: {}]  }
   0x1   :  { %11 = vsyncpa [#allocation3 + $0x1], 0  ;;  %s824_s15 = smov 0   ;;  %s826_s16 = smov 0  }
   0x2   :  { %s828_s17 = smov 0   ;;  %s830_s18 = smov 0  }
   0x3   :  { %s832_s19 = smov 0   ;;  %s834_s20 = smov 0  }
   0x4   :  { %s836_s21 = smov 0   ;;  %s838_s22 = smov 0  }
   0x5 LB: > { %996 = sst [smem:[#allocation5_spill]] %s784_s20  ;;  %s568_s23 = sadd.s32 4294967295, %s792_s22   ;;  %s792_s22 = sphi %s838_s22, %s17_s22   ;;  %s788_s21 = sphi %s836_s21, %s1006_s21   ;;  %s784_s20 = sphi %s834_s20, %s1005_s20   ;;  %s780_s19 = sphi %s832_s19, %s1004_s19   ;;  %s776_s18 = sphi %s830_s18, %s1003_s18   ;;  %s772_s17 = sphi %s828_s17, %s1009_s17   ;;  %s768_s16 = sphi %s826_s16, %s1008_s16   ;;  %s764_s15 = sphi %s824_s15, %s1007_s15  }
   0x6   : > { %997 = sst [smem:[#allocation6_spill]] %s788_s21  ;;  %s569_s24 = sadd.s32 4294967294, %s792_s22  }
   0x7   : > { %s26_s25 = sadd.s32 1, %s784_s20  ;;  %s29_s26 = sadd.s32 1, %s788_s21 }
   0x8   : > { %p27_p0 = scmp.ge.s32.totalorder %s26_s25, 2  ;;  %p182_p1 = scmp.ne.s32.totalorder %s772_s17, %s768_s16 }
   0x9   : > { %p183_p2 = scmp.eq.s32.totalorder %s568_s23, 3  ;;  %p188_p4 = scmp.ne.s32.totalorder %s768_s16, %s764_s15 }
   0xa   : > { %s1011_s25 = smov (%p27_p0, %s26_s25), 0  ;;  %s1013_s26 = smov (!%p27_p0, %s29_s26), %s788_s21 }
   0xb   : > { %998 = sst [smem:[#allocation7_spill]] %s1011_s25  ;;  %p873_p3 = por %p183_p2, %p182_p1 }
   0xc   : > { %p31_p5 = scmp.ge.s32.totalorder %s1013_s26, 2  ;;  %p189_p6 = scmp.eq.s32.totalorder %s569_s24, 3 }
   0xd   : > { %p580_p7 = scmp.ge.s32.totalorder %s792_s22, 1  ;;  %p267_p8 = scmp.lt.s32.totalorder %s792_s22, 5 }
   0xe   : > { %s1015_s26 = smov (%p31_p5, %s1013_s26), 0  ;;  %p883_p9 = por %p189_p6, %p188_p4 }
   0xf   : > { %1000 = sst [smem:[#allocation8_spill]] %s1015_s26  ;;  %p268_p10 = pnand %p580_p7, %p267_p8 }
  0x10   : > { %s169_s29 = ssub.s32 %s788_s21, %s1015_s26  ;;  %s172_s30 = sadd.s32 1, %s772_s17 }
  0x11   : > { %p170_p11 = scmp.eq.s32.totalorder %s169_s29, 0  ;;  %271 = sbr.rel (%p268_p10) target bundleno = 383 (0x17f), region = 36 }
  0x12   : > { %s993_s6 = sand.u32 (!%p268_p10), 1, %s768_s16   ;;  %s582_s7 = sshll.u32 (!%p268_p10), %s780_s19, 1 }
  0x13   : > { %s891_s5 = scalar_select %p170_p11, %s772_s17, %s172_s30  }
  0x14   : > { %s581_s8 = sshll.u32 (!%p268_p10), %s993_s6, 4  ;;  %s898_s9 = sadd.s32 (!%p268_p10), %s776_s18, %s582_s7 }
  0x15   : > { %p322_p12 = scmp.lt.s32.totalorder (!%p268_p10), %s898_s9, 2  ;;  %s914_s20 = scalar_lea.vmem (!%p268_p10), [#allocation2], %s581_s8 }
  0x16   : > { %p602_p13 = scmp.ne.s32.totalorder (!%p268_p10), %s776_s18, 0 }
  0x18   : > { %s323_s10 = scalar_select %p322_p12, %s898_s9, 2 }
  0x19   : > { %371 = sbr.rel (%p602_p13) target bundleno = 32 (0x20), region = 40  ;;  %v794_v0 = vmov (!%p602_p13), 0.0  }
  0x1a   : > { %s1017_s10 = smov (!%p322_p12, %s323_s10), 2  ;;  %372 = vst [vmem:[%s914_s20] sm:$0xff] (!%p602_p13), %v794_v0  ;;  %373 = vst [vmem:[%s914_s20 + $0x8] sm:$0xff] (!%p602_p13), %v794_v0 }
  0x1b   : > { %s586_s11 = sshll.u32 %s1017_s10, 3 }
  0x1c   : > { %s327_s14 = scalar_lea.vmem %s987_s0, %s586_s11  ;;  %s339_s29 = scalar_lea.vmem %s988_s1, %s586_s11 }
  0x1d   : > { %s351_s6 = scalar_lea.vmem %s989_s2, %s586_s11  ;;  %s363_s21 = scalar_lea.vmem %s990_s3, %s586_s11 }
  0x20 PF: > { %v382_v1 = vld [vmem:[%s327_s14] sm:$0xff]  ;;  %v795_v3 = vmov 0   ;;  %v377_v12 = vlaneseq  ;;  %s604_s18 = sshll.u32 %s898_s9, 3  ;;  %s459_s25 = sshll.u32 %s914_s20, 4  ;;  %s930_s25 = int_to_ptr.vmem [resolvable:$true] %s459_s25 }
  0x21   : > { %v383_v2 = vld [vmem:[%s339_s29] sm:$0xff]  ;;  %384 = vmax.xlane.f32.xlu0 %v382_v1  ;;  %688 = vset.pattern.permute.xlu1 %v795_v3  ;;  %v379_v23 = vstv %s604_s18  ;;  %v605_v50 = vld [vmem:[%s914_s20 + $0x8] sm:$0xff]  ;;  %s1002_s9 = sand.u32 1, %s768_s16   ;;  %s796_s11 = smov [#allocation2]  }
  0x22   : > { %v414_v4 = vld [vmem:[%s351_s6] sm:$0xff]  ;;  %396 = vperm.xlu1 %688, %v383_v2   ;;  %689 = vset.pattern.permute.xlu0 %v795_v3  ;;  %v394_v14 = vand.u32 127, %v377_v12  ;;  %v378_v22 = vshrl.u32 %v377_v12, 7  ;;  %s935_s10 = scalar_lea.sflag [#allocation3], %s1002_s9  ;;  %s702_s12 = sshll.u32 %s796_s11, 4  ;;  %s703_s12 = int_to_ptr.vmem [resolvable:$false] %s702_s12 }
  0x23   : > { %v415_v5 = vld [vmem:[%s363_s21] sm:$0xff]  ;;  %s612_s21 = sshll.u32 %s780_s19, 8  ;;  %s698_s19 = scalar_lea.vmem %s930_s25, 256 }
  0x24   : > { %v380_v24 = vadd.s32 %v379_v23, %v378_v22  ;;  %v411_v45 = vld [vmem:[%s914_s20] sm:$0xff]  ;;  %s928_s8 = scalar_lea.hbm %s991_s4, %s612_s21  ;;  %p699_p0 = scmp.ne.s32.totalorder %s930_s25, %s698_s19 }
  0x25   : > { %416 = vmax.xlane.f32.xlu0 %v414_v4  ;;  %s704_s13 = scalar_lea.vmem %s703_s12, 512  ;;  %p705_p4 = scmp.lt.s32.totalorder %s930_s25, %s703_s12 }
  0x26   : > { %426 = vperm.xlu1 %688, %v415_v5   ;;  %vm381_vm2 = vcmp.lt.s32.totalorder %v380_v24, 20  ;;  %p700_p1 = pnand %p699_p0, %p873_p3  ;;  %p706_p5 = scmp.lt.s32.totalorder %s704_s13, %s698_s19 }
  0x28   : > { %p701_p2 = pneg %p700_p1  ;;  %p707_p6 = por %p706_p5, %p705_p4 }
  0x2a   : > { %p708_p7 = pnand %p707_p6, %p701_p2 }
  0xa1   : > { %v397_v13 = vpop.permute.xlu1 %396 }
  0xa2   : > { %vm398_vm0 = vcmp.eq.s32.totalorder %v394_v14, %v397_v13 }
  0xa5   : > { %v427_v16 = vpop.permute.xlu1 %426 }
  0xa6   : > { %vm428_vm1 = vcmp.eq.s32.totalorder %v394_v14, %v427_v16 }
  0xae   : > { %v385_v6 = vpop.xlane.xlu0 %384 }
  0xaf   : > { %v386_v7 = vsub.f32 %v382_v1, %v385_v6 }
  0xb1   : > { %v387_v8 = vmul.f32 1.442695, %v386_v7  ;;  %v399_v18 = vsel %vm398_vm0, %v386_v7, 0.0 }
  0xb2   : > { %v417_v9 = vpop.xlane.xlu0 %416 }
  0xb3   : > { %690 = vpow2.f32 %v387_v8  ;;  %v418_v10 = vsub.f32 %v414_v4, %v417_v9 }
  0xb5   : > { %v419_v11 = vmul.f32 1.442695, %v418_v10  ;;  %v429_v19 = vsel %vm428_vm1, %v418_v10, 0.0 }
  0xb7   : > { %692 = vpow2.f32 %v419_v11 }
  0xbd   : > { %v691_v15 = vpop.eup %690 }
  0xbe   : > { %389 = vadd.xlane.f32.xlu0 %v691_v15 }
  0xc1   : > { %v693_v17 = vpop.eup %692 }
  0xc2   : > { %421 = vadd.xlane.f32.xlu1 %v693_v17  ;;  %400 = vadd.xlane.f32.xlu0 %v399_v18 }
  0xc6   : > { %430 = vadd.xlane.f32.xlu0 %v429_v19 }
 0x14b   : > { %v390_v20 = vpop.xlane.xlu0 %389 }
 0x14c   : > { %694 = vlog2.f32 %v390_v20 }
 0x14f   : > { %v422_v21 = vpop.xlane.xlu1 %421  ;;  %v401_v26 = vpop.xlane.xlu0 %400 }
 0x150   : > { %696 = vlog2.f32 %v422_v21 }
 0x153   : > { %v431_v33 = vpop.xlane.xlu0 %430 }
 0x156   : > { %v695_v25 = vpop.eup %694 }
 0x157   : > { %v392_v27 = vmul.f32 0.6931472, %v695_v25 }
 0x159   : > { %v402_v28 = vsub.f32 %v392_v27, %v401_v26 }
 0x15a   : > { %v697_v29 = vpop.eup %696 }
 0x15b   : > { %v403_v30 = vsel %vm381_vm2, %v402_v28, 0.0  ;;  %v424_v31 = vmul.f32 0.6931472, %v697_v29 }
 0x15c   : > { %v404_v32 = vrot.slane %v403_v30, 4 }
 0x15d   : > { %v432_v34 = vsub.f32 %v424_v31, %v431_v33 }
 0x15e   : > { %v405_v35 = vadd.f32 %v404_v32, %v403_v30 }
 0x15f   : > { %v433_v36 = vsel %vm381_vm2, %v432_v34, 0.0 }
 0x160   : > { %v406_v37 = vrot.slane %v405_v35, 2  ;;  %v434_v38 = vrot.slane %v433_v36, 4 }
 0x162   : > { %v407_v39 = vadd.f32 %v406_v37, %v405_v35  ;;  %v435_v40 = vadd.f32 %v434_v38, %v433_v36 }
 0x164   : > { %v408_v41 = vrot.slane %v407_v39, 1  ;;  %v436_v42 = vrot.slane %v435_v40, 2 }
 0x166   : > { %v409_v43 = vadd.f32 %v408_v41, %v407_v39  ;;  %v437_v44 = vadd.f32 %v436_v42, %v435_v40 }
 0x168   : > { %v410_v46 = vmul.f32 0.05, %v409_v43  ;;  %v438_v47 = vrot.slane %v437_v44, 1 }
 0x16a   : > { %v412_v48 = vadd.f32 %v411_v45, %v410_v46  ;;  %v439_v49 = vadd.f32 %v438_v47, %v437_v44 }
 0x16c   : > { %413 = vst [vmem:[%s914_s20] sm:$0xff] %v412_v48  ;;  %v440_v51 = vmul.f32 0.05, %v439_v49 }
 0x16e   : > { %v443_v52 = vadd.f32 %v605_v50, %v440_v51 }
 0x170   : > { %606 = vst [vmem:[%s914_s20 + $0x8] sm:$0xff] %v443_v52 }
 0x171   : > { %711 = shalt.err (!%p708_p7)
}
 0x172   : > { %s712_s20 = scalar_lea.hbm %s928_s8, 256  ;;  %s716_s24 = scalar_lea.hbm %s991_s4, 512 }
 0x173   : > { %p713_p8 = scmp.ne.s32.totalorder %s928_s8, %s712_s20  ;;  %p717_p12 = scmp.lt.u32.totalorder %s928_s8, %s991_s4 }
 0x174   : > { %p718_p13 = scmp.lt.u32.totalorder %s716_s24, %s712_s20  ;;  %p720_p1 = scmp.lt.u32.totalorder %s712_s20, %s928_s8 }
 0x175   : > { %p714_p10 = pnand %p713_p8, %p873_p3 }
 0x176   : > { %p719_p0 = por %p718_p13, %p717_p12 }
 0x177   : > { %p715_p11 = pneg %p714_p10 }
 0x178   : > { %p721_p2 = por %p720_p1, %p719_p0 }
 0x17a   : > { %p722_p4 = pnand %p721_p2, %p715_p11 }
 0x17c   : > { %725 = shalt.err (!%p722_p4)
}
 0x17d   : > { %s797_s7 = smov 128   ;;  %s798_s18 = smov 8  }
 0x17e   : > { %613 = dma.vmem_to_hbm [thread:$0]  (%p873_p3), %s930_s25, 256, %s928_s8, %s935_s10, %s797_s7, %s797_s7, %s798_s18  }
 0x17f PF: > { %p619_p5 = scmp.ge.s32.totalorder %s792_s22, 2  ;;  %s474_s21 = sand.u32 1, %s764_s15  }
 0x180   : > { %s475_s26 = scalar_lea.sflag [#allocation3], %s474_s21 }
 0x181   : > { %p616_p6 = pnand %p619_p5, %p883_p9 }
 0x183   : > { %759 = dma.done.wait (!%p616_p6), %s475_s26, 256  }
 0x184   : > { %761 = vsyncadd (!%p616_p6), %s475_s26, 4294967040  ;;  %s17_s22 = sadd.s32 1, %s792_s22   ;;  %s1003_s18 = sld [smem:[#allocation5_spill]] }
 0x185   : > { %p14_p7 = scmp.ge.s32.totalorder %s17_s22, 6   ;;  %s1004_s19 = sld [smem:[#allocation6_spill]] }
 0x186   : > { %s1005_s20 = sld [smem:[#allocation7_spill]]  ;;  %s1006_s21 = sld [smem:[#allocation8_spill]] }
 0x187   : > { %s1007_s15 = smov %s768_s16  ;;  %s1008_s16 = smov %s772_s17 }
 0x188   : > { %s1009_s17 = smov %s891_s5  ;;  %16 = sbr.rel (!%p14_p7) target bundleno = 5 (0x5), region = 85 }
 0x18f   :  { %480 = vsyncpa [#allocation3], 1 }
 0x190   :  { %482 = vsyncpa [#allocation3 + $0x1], 1 }

</bundles_post_ra>
